<compile_context>
chip_gen: v5e
topology: v5e:2x2
jax: 0.10.0
libtpu: 0.0.40
codegen_flags: <defaults>
</compile_context>

<pallas_src>
import jax
import jax.numpy as jnp
from jax.experimental import pallas as pl
from jax.experimental.pallas import tpu as pltpu


def _round_up(x, m):
    return (x + m - 1) // m * m


def _nbytes(shape, dtype):
    n = 1
    for d in shape:
        n *= int(d)
    return n * jnp.dtype(dtype).itemsize


def _vmem_limit(tile_bytes, floor=32 << 20, ceil=64 << 20):
    # Double-buffered tiles + headroom; clamp to a limit every chip can scope
    # (v7x physical VMEM is 64 MiB).
    want = 2 * tile_bytes + (4 << 20)
    return int(min(max(want, floor), ceil))


def _pick_tile(dim, candidates):
    for c in candidates:
        if dim % c == 0 and dim > c:
            return c
    return dim


# ---------------------------------------------------------------------------
# Batched matmul + bias: (M, K) @ (K, N) + b, 2-D parallel tiling over (M, N).
# N tile 512/256 fills the 256-wide MXU on v6e/v7x; small N (e.g. 128) keeps
# the full-dim tile. M tiling gives v7x's two TensorCores a balanced split and
# keeps the f32 out tile small.
# ---------------------------------------------------------------------------
def matmul_bias_kernel(x_ref, w_ref, b_ref, o_ref):
    o_ref[...] = (jnp.dot(x_ref[...], w_ref[...],
                          preferred_element_type=jnp.float32)
                  + b_ref[...]).astype(o_ref.dtype)


def matmul_bias(x, w, b, out_dtype=jnp.float32):
    M, K = x.shape
    N = w.shape[1]
    tn = _pick_tile(N, (512, 256, 128))
    tm = _pick_tile(M, (256, 128))

    tile_bytes = (_nbytes((tm, K), x.dtype) + _nbytes((K, tn), w.dtype)
                  + _nbytes((1, tn), b.dtype) + _nbytes((tm, tn), out_dtype))

    return pl.pallas_call(
        matmul_bias_kernel,
        out_shape=jax.ShapeDtypeStruct((M, N), out_dtype),
        grid_spec=pltpu.PrefetchScalarGridSpec(
            num_scalar_prefetch=0,
            grid=(M // tm, N // tn),
            in_specs=[
                pl.BlockSpec((tm, K), lambda i, j: (i, 0)),
                pl.BlockSpec((K, tn), lambda i, j: (0, j)),
                pl.BlockSpec((1, tn), lambda i, j: (0, j)),
            ],
            out_specs=pl.BlockSpec((tm, tn), lambda i, j: (i, j)),
        ),
        compiler_params=pltpu.CompilerParams(
            dimension_semantics=("parallel", "parallel"),
            vmem_limit_bytes=_vmem_limit(tile_bytes)),
    )(x, w, b)


# ---------------------------------------------------------------------------
# LSTM recurrence, time-chunked. xproj already contains
# x_t @ W_ih + (b_ih + b_hh) (bf16) for every timestep; only the small
# (Bp,H)@(H,4H) recurrent matmul + elementwise gate update remain on the
# sequential critical path. h/c live in f32 VMEM scratch persistent across
# the (sequential, "arbitrary") time-chunk grid.
# ---------------------------------------------------------------------------
def lstm_recurrence_kernel(xproj_ref, whh_ref, hs_ref, h_scr, c_scr):
    Tc = xproj_ref.shape[0]
    H = whh_ref.shape[0]
    Bp = h_scr.shape[0]

    @pl.when(pl.program_id(0) == 0)
    def _():
        h_scr[...] = jnp.zeros_like(h_scr)
        c_scr[...] = jnp.zeros_like(c_scr)

    lane_aligned = (H % 128 == 0)
    if not lane_aligned:
        # Hoisted lane mask selecting the g-gate block (PyTorch order [i,f,g,o]).
        lane = jax.lax.broadcasted_iota(jnp.int32, (Bp, 4 * H), 1)
        is_g = (lane >= 2 * H) & (lane < 3 * H)

    def step(t, carry):
        h = h_scr[...]
        c = c_scr[...]
        gates = (xproj_ref[t].astype(jnp.float32)
                 + jnp.dot(h.astype(jnp.bfloat16), whh_ref[...],
                           preferred_element_type=jnp.float32))
        if lane_aligned:
            # 128-lane-aligned slices: sigmoid only on [i,f,o], tanh only on
            # [g] -> halves per-step EUP work vs. a full-vreg blend.
            if_g = jax.nn.sigmoid(gates[:, 0:2 * H])
            i_g = if_g[:, 0:H]
            f_g = if_g[:, H:2 * H]
            g_g = jnp.tanh(gates[:, 2 * H:3 * H])
            o_g = jax.nn.sigmoid(gates[:, 3 * H:4 * H])
        else:
            # Full-vreg blend (avoids sub-128-lane slicing of the EUP inputs).
            act = jnp.where(is_g, jnp.tanh(gates), jax.nn.sigmoid(gates))
            i_g = act[:, 0:H]
            f_g = act[:, H:2 * H]
            g_g = act[:, 2 * H:3 * H]
            o_g = act[:, 3 * H:4 * H]
        c_new = f_g * c + i_g * g_g
        h_new = o_g * jnp.tanh(c_new)
        c_scr[...] = c_new
        h_scr[...] = h_new
        hs_ref[t] = h_new.astype(hs_ref.dtype)
        return carry

    # Bounded unroll: keeps LLO scheduling visibility without blowing the
    # 64-vreg file / spill traffic at realistic (Bp, 4H).
    jax.lax.fori_loop(0, Tc, step, 0, unroll=2)


def lstm_recurrence(xproj_tb4h, w_hh, time_chunk):
    Tp, Bp, G = xproj_tb4h.shape
    H = w_hh.shape[0]
    Tc = min(time_chunk, Tp)
    assert Tp % Tc == 0

    tile_bytes = (_nbytes((Tc, Bp, G), xproj_tb4h.dtype)
                  + _nbytes((H, G), w_hh.dtype)
                  + _nbytes((Tc, Bp, H), jnp.bfloat16)
                  + 2 * _nbytes((Bp, H), jnp.float32))

    return pl.pallas_call(
        lstm_recurrence_kernel,
        out_shape=jax.ShapeDtypeStruct((Tp, Bp, H), jnp.bfloat16),
        grid_spec=pltpu.PrefetchScalarGridSpec(
            num_scalar_prefetch=0,
            grid=(Tp // Tc,),
            in_specs=[
                pl.BlockSpec((Tc, Bp, G), lambda i: (i, 0, 0)),
                pl.BlockSpec((H, G), lambda i: (0, 0)),
            ],
            out_specs=pl.BlockSpec((Tc, Bp, H), lambda i: (i, 0, 0)),
            scratch_shapes=[pltpu.VMEM((Bp, H), jnp.float32),
                            pltpu.VMEM((Bp, H), jnp.float32)],
        ),
        compiler_params=pltpu.CompilerParams(
            dimension_semantics=("arbitrary",),
            vmem_limit_bytes=_vmem_limit(tile_bytes)),
    )(xproj_tb4h, w_hh)


class DecoderRNNParams:
    """Deterministic parameter construction mirroring the PyTorch module."""

    def __init__(self, key, embed_size, hidden_size, vocab_size):
        self.embed_size = embed_size
        self.hidden_size = hidden_size
        self.vocab_size = vocab_size
        k_emb, k_ih, k_hh, k_bih, k_bhh, k_fc = jax.random.split(key, 6)

        # nn.Embedding default init: N(0, 1)
        self.embedding = jax.random.normal(
            k_emb, (vocab_size, embed_size), jnp.float32)

        # nn.LSTM default init: U(-1/sqrt(H), 1/sqrt(H)); gate order [i,f,g,o]
        s = 1.0 / jnp.sqrt(hidden_size)
        self.w_ih = jax.random.uniform(
            k_ih, (embed_size, 4 * hidden_size), jnp.float32, -s, s)
        self.w_hh = jax.random.uniform(
            k_hh, (hidden_size, 4 * hidden_size), jnp.float32, -s, s)
        b_ih = jax.random.uniform(
            k_bih, (4 * hidden_size,), jnp.float32, -s, s)
        b_hh = jax.random.uniform(
            k_bhh, (4 * hidden_size,), jnp.float32, -s, s)
        self.b_gates = (b_ih + b_hh)[None, :]  # (1, 4H)

        # fc: weight U(-0.1, 0.1), bias 0 (per init_weights)
        self.w_fc = jax.random.uniform(
            k_fc, (hidden_size, vocab_size), jnp.float32, -0.1, 0.1)
        self.b_fc = jnp.zeros((1, vocab_size), jnp.float32)


def decoder_rnn_forward(params, encoder_out, encoded_captions, time_chunk=8):
    """encoder_out: (B, E) float32; encoded_captions: (B, L) int32.

    Returns predictions (B, L, vocab) matching the PyTorch forward.
    """
    B, L = encoded_captions.shape
    E = params.embed_size
    H = params.hidden_size
    V = params.vocab_size

    # --- plain-JAX glue: embedding lookup, concat, layout, padding ---------
    embeddings = jnp.take(params.embedding, encoded_captions, axis=0)  # (B,L,E)
    embeddings = embeddings[:, 0:L - 1, :]
    dec_in = jnp.concatenate([encoder_out[:, None, :], embeddings], axis=1)
    x_tbe = jnp.transpose(dec_in, (1, 0, 2)).astype(jnp.float32)  # (T,B,E)

    T = L
    Bp = _round_up(max(B, 8), 8)          # full sublanes
    Vp = _round_up(V, 128)                # lane-dense fc output
    Tc = min(time_chunk, T)               # recurrence time-chunk
    Tp = _round_up(T, Tc)

    x_tbe = jnp.pad(x_tbe, ((0, Tp - T), (0, Bp - B), (0, 0)))

    w_ih = params.w_ih.astype(jnp.bfloat16)
    w_hh = params.w_hh.astype(jnp.bfloat16)
    w_fc = jnp.pad(params.w_fc, ((0, 0), (0, Vp - V))).astype(jnp.bfloat16)
    b_fc = jnp.pad(params.b_fc, ((0, 0), (0, Vp - V)))

    # --- hoisted input projection: one big matmul over all timesteps -------
    # bf16 preactivations halve the HBM + VMEM traffic the recurrence touches.
    x_flat = x_tbe.reshape(Tp * Bp, E).astype(jnp.bfloat16)
    xproj = matmul_bias(x_flat, w_ih, params.b_gates,
                        out_dtype=jnp.bfloat16).reshape(Tp, Bp, 4 * H)

    # --- sequential LSTM recurrence (time-chunked grid, persistent h/c) ----
    hs = lstm_recurrence(xproj, w_hh, time_chunk=Tc)    # (Tp, Bp, H) bf16

    # --- hoisted fc projection over all (Bp*T) hidden states ---------------
    # Transpose the tiny bf16 hidden states (not the big f32 logits) so the
    # fc output is already in (B, L, Vp) layout.
    # TODO(synk): dropout treated as eval-mode identity (no stochastic mask).
    hs_bt = jnp.transpose(hs[0:T], (1, 0, 2))           # (Bp, T, H) bf16
    preds = matmul_bias(hs_bt.reshape(Bp * T, H), w_fc, b_fc,
                        out_dtype=jnp.float32).reshape(Bp, T, Vp)

    return preds[0:B, :, 0:V]                            # (B, L, V)


if __name__ == "__main__":
    embed_size = 32
    hidden_size = 32
    vocab_size = 64
    batch = 2
    seq_len = 8

    key = jax.random.PRNGKey(0)
    k_params, k_enc, k_cap = jax.random.split(key, 3)

    params = DecoderRNNParams(k_params, embed_size, hidden_size, vocab_size)
    encoder_out = jax.random.normal(k_enc, (batch, embed_size), jnp.float32)
    encoded_captions = jax.random.randint(
        k_cap, (batch, seq_len), 0, vocab_size, dtype=jnp.int32)

    preds = decoder_rnn_forward(params, encoder_out, encoded_captions)
    preds = jax.block_until_ready(preds)
    assert preds.shape == (batch, seq_len, vocab_size)
    assert bool(jnp.all(jnp.isfinite(preds)))
    print("KERNEL_OK")
</pallas_src>

<mosaic_0001>
module attributes {stable_mosaic.version = 11 : i64} {
  func.func @matmul_bias_kernel(%arg0: i32, %arg1: i32, %arg2: memref<64x32xbf16, #tpu.memory_space<vmem>>, %arg3: memref<32x128xbf16, #tpu.memory_space<vmem>>, %arg4: memref<1x128xf32, #tpu.memory_space<vmem>>, %arg5: memref<64x128xbf16, #tpu.memory_space<vmem>>) attributes {dimension_semantics = [#tpu.dimension_semantics<parallel>, #tpu.dimension_semantics<parallel>], iteration_bounds = array<i64: 1, 1>, scalar_prefetch = 0 : i64, scratch_operands = 0 : i64, tpu.core_type = #tpu.core_type<tc>, window_params = [{transform_indices = @transform_0, window_bounds = array<i64: 64, 32>}, {transform_indices = @transform_1, window_bounds = array<i64: 32, 128>}, {transform_indices = @transform_2, window_bounds = array<i64: 1, 128>}, {transform_indices = @transform_3, window_bounds = array<i64: 64, 128>}]} {
    %c0 = arith.constant 0 : index
    %c0_0 = arith.constant 0 : index
    %0 = vector.load %arg2[%c0, %c0_0] : memref<64x32xbf16, #tpu.memory_space<vmem>>, vector<64x32xbf16>
    %c0_1 = arith.constant 0 : index
    %c0_2 = arith.constant 0 : index
    %1 = vector.load %arg3[%c0_1, %c0_2] : memref<32x128xbf16, #tpu.memory_space<vmem>>, vector<32x128xbf16>
    %cst = arith.constant dense<0.000000e+00> : vector<64x128xf32>
    %2 = tpu.matmul %0, %1, %cst {dimension_numbers = #tpu.dot_dimension_numbers<[1], [0], [0], [1], [0, 0, 1, 1], [], []>} : vector<64x32xbf16>, vector<32x128xbf16>, vector<64x128xf32> -> vector<64x128xf32>
    %c0_3 = arith.constant 0 : index
    %c0_4 = arith.constant 0 : index
    %3 = vector.load %arg4[%c0_3, %c0_4] : memref<1x128xf32, #tpu.memory_space<vmem>>, vector<1x128xf32>
    %4 = vector.broadcast %3 : vector<1x128xf32> to vector<64x128xf32>
    %5 = arith.addf %2, %4 : vector<64x128xf32>
    %6 = arith.truncf %5 : vector<64x128xf32> to vector<64x128xbf16>
    %c0_5 = arith.constant 0 : index
    %c0_6 = arith.constant 0 : index
    %7 = vector.load %arg5[%c0_5, %c0_6] : memref<64x128xbf16, #tpu.memory_space<vmem>>, vector<64x128xbf16>
    tpu.vector_store %arg5[%c0_5, %c0_6], %6 {strides = array<i32>} : memref<64x128xbf16, #tpu.memory_space<vmem>>, vector<64x128xbf16>,
    return
  }
  func.func @transform_0(%arg0: i32, %arg1: i32) -> (i32, i32) {
    %c0_i32 = arith.constant 0 : i32
    %c0_i32_0 = arith.constant 0 : i32
    return %arg0, %c0_i32 : i32, i32
  }
  func.func @transform_1(%arg0: i32, %arg1: i32) -> (i32, i32) {
    %c0_i32 = arith.constant 0 : i32
    %c0_i32_0 = arith.constant 0 : i32
    return %c0_i32, %arg1 : i32, i32
  }
  func.func @transform_2(%arg0: i32, %arg1: i32) -> (i32, i32) {
    %c0_i32 = arith.constant 0 : i32
    %c0_i32_0 = arith.constant 0 : i32
    return %c0_i32, %arg1 : i32, i32
  }
  func.func @transform_3(%arg0: i32, %arg1: i32) -> (i32, i32) {
    %c0_i32 = arith.constant 0 : i32
    return %arg0, %arg1 : i32, i32
  }
}

</mosaic_0001>

<bundles_post_ra>
// kernel: tpu_custom_call.1
= control target key start
LH: loop header
LB: loop body
LE: loop exit
PB: predicated region body
PF: predicated region fallthrough
CT: control target
= control target key end

     0   :  { %s280_s0 = inlined_call_operand.vmem [shape: bf16[64,32], index: 0, kind: input, shape index: {}]   ;;  %s281_s1 = inlined_call_operand.vmem [shape: bf16[32,128], index: 1, kind: input, shape index: {}]   ;;  %s282_s2 = inlined_call_operand.vmem [shape: f32[1,128], index: 2, kind: input, shape index: {}]   ;;  %s283_s3 = inlined_call_operand.hbm [shape: bf16[64,128], index: 3, kind: output, shape index: {}]  }
   0x1   :  { %v173_v0 = vld [vmem:[%s281_s1 + $0x8] sm:$0xff]  ;;  %v172_v1 = vld [vmem:[%s281_s1] sm:$0xff] }
   0x2   :  { %83 = vmatpush.bf16.msra.mxu0 %v173_v0  ;;  %197 = vmatpush.bf16.msra.mxu1 %v173_v0 }
   0x3   :  { %8 = vsyncpa [#allocation3], 0  ;;  %198 = vmatpush.bf16.msra.mxu2 %v173_v0  ;;  %199 = vmatpush.bf16.msra.mxu3 %v173_v0  ;;  %v168_v2 = vld [vmem:[%s280_s0] sm:$0xff]  ;;  %v169_v3 = vld [vmem:[%s280_s0 + $0x8] sm:$0xff]  ;;  %vm64_vm0 = vcmask 261120   ;;  %s234_s28 = smov 64  }
   0x4   :  { %v170_v4 = vld [vmem:[%s280_s0 + $0x10] sm:$0xff]  ;;  %v171_v5 = vld [vmem:[%s280_s0 + $0x18] sm:$0xff]  ;;  %v206_v8 = vld [vmem:[%s282_s2] ss:$0 sm:$0xff]  ;;  %s233_s0 = smov [#allocation2]   ;;  %s128_s2 = sshll.u32 %s283_s3, 4  ;;  %s129_s2 = int_to_ptr.hbm [resolvable:$true] %s128_s2 }
   0x5   :  { %s126_s25 = sshll.u32 %s233_s0, 4  ;;  %s235_s29 = smov 4   ;;  %s127_s25 = int_to_ptr.vmem [resolvable:$true] %s126_s25 }
   0x6   :  { %84 = vmatpush.bf16.msra.mxu0 %v172_v1  ;;  %200 = vmatpush.bf16.msra.mxu1 %v172_v1 }
   0x7   :  { %201 = vmatpush.bf16.msra.mxu2 %v172_v1  ;;  %202 = vmatpush.bf16.msra.mxu3 %v172_v1 }
   0x9   :  { %164 = vmatmul.msk.bf16.vlgmr.msra.gmra.mxu0 %vm64_vm0, %v168_v2  ;;  %165 = vmatmul.msk.bf16.vlgmr.msra.gmra.mxu1 %vm64_vm0, %v169_v3 }
   0xa   :  { %166 = vmatmul.msk.bf16.vlgmr.msra.gmra.mxu2 %vm64_vm0, %v170_v4  ;;  %167 = vmatmul.msk.bf16.vlgmr.msra.gmra.mxu3 %vm64_vm0, %v171_v5 }
  0x86   :  { %v86_v6 = vpop.f32.mrf.mxu0  ;;  %v91_v7 = vpop.f32.mrf.mxu1 }
  0x87   :  { %v87_v13 = vadd.f32 %v206_v8, %v86_v6  ;;  %v92_v14 = vadd.f32 %v206_v8, %v91_v7 }
  0x8d   :  { %v96_v9 = vpop.f32.mrf.mxu2  ;;  %v101_v10 = vpop.f32.mrf.mxu3 }
  0x8e   :  { %v88_v11 = vpop.f32.mrf.mxu0  ;;  %v93_v12 = vpop.f32.mrf.mxu1  ;;  %v97_v21 = vadd.f32 %v206_v8, %v96_v9  ;;  %v102_v22 = vadd.f32 %v206_v8, %v101_v10 }
  0x8f   :  { %v89_v15 = vadd.f32 %v206_v8, %v88_v11  ;;  %v94_v16 = vadd.f32 %v206_v8, %v93_v12 }
  0x91   :  { %v177_v17 = vpack.c.bf16 %v89_v15, %v87_v13  ;;  %v182_v18 = vpack.c.bf16 %v94_v16, %v92_v14 }
  0x93   :  { %178 = vst [vmem:[#allocation2] sm:$0xff] %v177_v17  }
  0x94   :  { %194 = vst [vmem:[#allocation2 + $0x8] sm:$0xff] %v182_v18  }
  0x95   :  { %v98_v19 = vpop.f32.mrf.mxu2  ;;  %v103_v20 = vpop.f32.mrf.mxu3 }
  0x96   :  { %v99_v23 = vadd.f32 %v206_v8, %v98_v19  ;;  %v104_v24 = vadd.f32 %v206_v8, %v103_v20 }
  0x98   :  { %v187_v25 = vpack.c.bf16 %v99_v23, %v97_v21  ;;  %v192_v26 = vpack.c.bf16 %v104_v24, %v102_v22 }
  0x9a   :  { %195 = vst [vmem:[#allocation2 + $0x10] sm:$0xff] %v187_v25  }
  0x9b   :  { %196 = vst [vmem:[#allocation2 + $0x18] sm:$0xff] %v192_v26  }
  0x9c   :  { %134 = dma.vmem_to_hbm [thread:$0]  %s127_s25, 512, %s129_s2, [#allocation3], %s234_s28, %s234_s28, %s235_s29  }
  0x9d   :  { %231 = dma.done.wait [#allocation3], 512  }
  0x9e   :  { %232 = vsyncadd [#allocation3], 4294966784 }
  0x9f   :  { %139 = vsyncpa [#allocation3], 1 }

</bundles_post_ra>
